<compile_context>
chip_gen: v7x
topology: tpu7x:2x2x1
jax: 0.10.0
libtpu: 0.0.40
codegen_flags: <defaults>
</compile_context>

<pallas_src>
import jax
import jax.numpy as jnp
from jax.experimental import pallas as pl
from jax.experimental.pallas import tpu as pltpu

_LANE = 128
_SUBLANE = 8


def _round_up(x, m):
    return (x + m - 1) // m * m


def _qnet_kernel(x_ref, w1_ref, b1_ref, w2_ref, b2_ref, w3_ref, b3_ref, o_ref):
    """relu(relu(x@W1+b1)@W2+b2)@W3+b3 for one batch tile.

    Weights arrive as bf16 (MXU fast path); biases, activations and the
    accumulators are f32, so the elementwise path never runs bf16 on v5e.
    """
    x = x_ref[...].astype(jnp.bfloat16)  # cast point for bf16 MXU operands

    h1 = jnp.dot(x, w1_ref[...], preferred_element_type=jnp.float32)
    h1 = jnp.maximum(h1 + b1_ref[...], 0.0)

    h2 = jnp.dot(h1.astype(jnp.bfloat16), w2_ref[...],
                 preferred_element_type=jnp.float32)
    h2 = jnp.maximum(h2 + b2_ref[...], 0.0)

    q = jnp.dot(h2.astype(jnp.bfloat16), w3_ref[...],
                preferred_element_type=jnp.float32)
    o_ref[...] = (q + b3_ref[...]).astype(o_ref.dtype)


def prepare_qnetwork_params(params, num_layers=3):
    """Pad layer widths (hidden -> multiple of 128 lanes, action head ->
    multiple of 8) and cast weights to bf16.  Call ONCE outside the hot loop;
    qnetwork_forward expects this prepared form.

    ReLU(0)=0 plus zero rows in the following weight keep the math identical;
    padded action columns evaluate to exactly 0.0 and are sliced off in the
    wrapper (so they can never win a downstream max/argmax).
    """
    out = {}
    prev_pad = 0
    for li in range(1, num_layers + 1):
        w, b = params[f"w{li}"], params[f"b{li}"]
        _, fan_out = w.shape
        tgt = _SUBLANE if li == num_layers else _LANE
        out_pad = _round_up(fan_out, tgt) - fan_out
        w = jnp.pad(w, ((0, prev_pad), (0, out_pad)))
        b = jnp.pad(b, ((0, 0), (0, out_pad)))
        out[f"w{li}"] = w.astype(jnp.bfloat16)
        out[f"b{li}"] = b.astype(jnp.float32)
        prev_pad = out_pad
    return out


def _vmem_capacity_bytes():
    """Physical VMEM of the current generation (conservative 64 MiB fallback)."""
    try:
        cap = getattr(pltpu.get_tpu_info(), "vmem_capacity_bytes", None)
        if cap:
            return int(cap)
    except Exception:
        pass
    return 64 * 1024 * 1024


def _choose_block_b(B, row_cap):
    """Pick a multiple-of-8 batch tile that divides B, stays <= row_cap rows,
    and yields >= 2 grid steps whenever B >= 16 (so v7x's second TensorCore is
    used for mid-size batches).  Tiny batches or B % 8 != 0 run as one full
    block (correct, but large un-aligned batches lose tiling/megacore --
    pad the batch upstream if that matters)."""
    if B < 2 * _SUBLANE or B % _SUBLANE != 0:
        return B
    cap = max(_SUBLANE, min(row_cap, B // 2))
    bb = cap - cap % _SUBLANE
    while bb >= _SUBLANE and B % bb != 0:
        bb -= _SUBLANE
    return bb if bb >= _SUBLANE else B


def qnetwork_forward(state, kernel_params, *, action_size, block_b=None):
    """Fused QNetwork forward.

    state:         (B, state_size) float32
    kernel_params: output of prepare_qnetwork_params (padded, bf16 weights)
    action_size:   un-padded number of actions (static under jit)
    Returns (B, action_size) float32 Q-values.
    """
    B, S = state.shape
    w1, b1 = kernel_params["w1"], kernel_params["b1"]
    w2, b2 = kernel_params["w2"], kernel_params["b2"]
    w3, b3 = kernel_params["w3"], kernel_params["b3"]
    H1, H2, A_pad = w1.shape[1], w2.shape[1], w3.shape[1]
    assert w1.shape[0] == S and w2.shape[0] == H1 and w3.shape[0] == H2
    assert action_size <= A_pad

    vmem_cap = _vmem_capacity_bytes()
    # 128-MiB parts (v5e/v6e) take 16K-row tiles; 64-MiB v7x caps at 4K rows.
    row_cap = 16384 if vmem_cap >= (96 << 20) else 4096

    if block_b is None:
        block_b = _choose_block_b(B, row_cap)
    assert B % block_b == 0, "batch must divide evenly into block_b"
    grid = (B // block_b,)

    # Live-VMEM estimate: double-buffered I/O tiles, f32 h1/h2/q temps, the
    # bf16 copies fed to the MXU, and the resident weights.  Ask for 2x as
    # headroom but never more than ~75% of physical VMEM (leaves room for
    # compiler-internal scratch on v7x's 64 MiB).
    weight_bytes = (S * H1 + H1 * H2 + H2 * A_pad) * 2 + (H1 + H2 + A_pad) * 4
    per_row = (2 * S * 4                 # input tile, double-buffered
               + 2 * A_pad * 4           # output tile, double-buffered
               + (H1 + H2 + A_pad) * 4   # f32 h1 / h2 / q
               + (S + H1 + H2) * 2)      # bf16 casts of x / h1 / h2
    est = block_b * per_row + 2 * weight_bytes
    vmem_limit = int(min(int(vmem_cap * 0.75),
                         max(2 * est, 32 * 1024 * 1024)))

    def full_spec(shape):
        # Whole tensor, same block every grid step: weights/biases stay
        # resident in VMEM and are never re-fetched after step 0.
        return pl.BlockSpec(shape, lambda i: (0,) * len(shape))

    flops = 2 * B * (S * H1 + H1 * H2 + H2 * A_pad)
    bytes_accessed = B * S * 4 + B * A_pad * 4 + weight_bytes

    out = pl.pallas_call(
        _qnet_kernel,
        out_shape=jax.ShapeDtypeStruct((B, A_pad), jnp.float32),
        grid_spec=pltpu.PrefetchScalarGridSpec(
            num_scalar_prefetch=0,
            grid=grid,
            in_specs=[
                pl.BlockSpec((block_b, S), lambda i: (i, 0)),   # state tile
                full_spec((S, H1)),
                full_spec((1, H1)),
                full_spec((H1, H2)),
                full_spec((1, H2)),
                full_spec((H2, A_pad)),
                full_spec((1, A_pad)),
            ],
            out_specs=pl.BlockSpec((block_b, A_pad), lambda i: (i, 0)),
        ),
        compiler_params=pltpu.CompilerParams(
            dimension_semantics=("parallel",),
            vmem_limit_bytes=vmem_limit,
        ),
        cost_estimate=pl.CostEstimate(
            flops=flops, transcendentals=0, bytes_accessed=bytes_accessed),
    )(state, w1, b1, w2, b2, w3, b3)

    if A_pad == action_size:
        return out
    # Padded action columns are exactly 0.0 -- slice before any consumer can
    # max/argmax over them.  The stored width is only 8 lanes, so this re-read
    # is 32 B/row (vs 512 B/row in the old 128-lane layout).
    return out[:, :action_size]


def init_qnetwork_params(key, state_size, action_size, hidden_sizes=(128, 64)):
    """Deterministic init mimicking nn.Linear's U(-1/sqrt(fan_in), 1/sqrt(fan_in)).
    Weights are stored transposed, i.e. (fan_in, fan_out)."""
    sizes = [state_size, *hidden_sizes, action_size]
    params = {}
    for li, (fan_in, fan_out) in enumerate(zip(sizes[:-1], sizes[1:]), start=1):
        key, kw, kb = jax.random.split(key, 3)
        bound = 1.0 / jnp.sqrt(jnp.float32(fan_in))
        params[f"w{li}"] = jax.random.uniform(
            kw, (fan_in, fan_out), jnp.float32, -bound, bound)
        params[f"b{li}"] = jax.random.uniform(
            kb, (1, fan_out), jnp.float32, -bound, bound)
    return params


def qnetwork_ref(state, params):
    """Pure-JAX f32 reference for correctness checking."""
    h = jnp.maximum(state @ params["w1"] + params["b1"], 0.0)
    h = jnp.maximum(h @ params["w2"] + params["b2"], 0.0)
    return h @ params["w3"] + params["b3"]


if __name__ == "__main__":
    key = jax.random.PRNGKey(0)
    k_param, k_state = jax.random.split(key)

    batch = 8
    state_size = 16
    action_size = 4
    hidden_sizes = (128, 64)

    params = init_qnetwork_params(k_param, state_size, action_size, hidden_sizes)
    state = jax.random.normal(k_state, (batch, state_size), jnp.float32)

    # Pad / cast the parameters ONCE (hoisted out of the per-step path), then
    # run the forward under a single jit so no per-call pads/casts re-execute.
    kernel_params = prepare_qnetwork_params(params)
    fwd = jax.jit(qnetwork_forward, static_argnames=("action_size", "block_b"))

    q_vals = fwd(state, kernel_params, action_size=action_size)
    q_vals = jax.block_until_ready(q_vals)

    q_ref = qnetwork_ref(state, params)
    assert q_vals.shape == (batch, action_size)
    # bf16 MXU operands -> loosen tolerance vs the f32 reference.
    assert jnp.allclose(q_vals, q_ref, atol=2e-2, rtol=2e-2), "mismatch vs reference"

    print("KERNEL_OK")
</pallas_src>

<mosaic_0001>
module attributes {stable_mosaic.version = 11 : i64} {
  func.func @_qnet_kernel(%arg0: i32, %arg1: memref<8x16xf32, #tpu.memory_space<vmem>>, %arg2: memref<16x128xbf16, #tpu.memory_space<vmem>>, %arg3: memref<1x128xf32, #tpu.memory_space<vmem>>, %arg4: memref<128x128xbf16, #tpu.memory_space<vmem>>, %arg5: memref<1x128xf32, #tpu.memory_space<vmem>>, %arg6: memref<128x8xbf16, #tpu.memory_space<vmem>>, %arg7: memref<1x8xf32, #tpu.memory_space<vmem>>, %arg8: memref<8x8xf32, #tpu.memory_space<vmem>>) attributes {dimension_semantics = [#tpu.dimension_semantics<parallel>], iteration_bounds = array<i64: 1>, scalar_prefetch = 0 : i64, scratch_operands = 0 : i64, tpu.core_type = #tpu.core_type<tc>, window_params = [{transform_indices = @transform_0, window_bounds = array<i64: 8, 16>}, {pipeline_mode = #tpu.pipeline_mode<synchronous>, transform_indices = @transform_1, window_bounds = array<i64: 16, 128>}, {pipeline_mode = #tpu.pipeline_mode<synchronous>, transform_indices = @transform_2, window_bounds = array<i64: 1, 128>}, {pipeline_mode = #tpu.pipeline_mode<synchronous>, transform_indices = @transform_3, window_bounds = array<i64: 128, 128>}, {pipeline_mode = #tpu.pipeline_mode<synchronous>, transform_indices = @transform_4, window_bounds = array<i64: 1, 128>}, {pipeline_mode = #tpu.pipeline_mode<synchronous>, transform_indices = @transform_5, window_bounds = array<i64: 128, 8>}, {pipeline_mode = #tpu.pipeline_mode<synchronous>, transform_indices = @transform_6, window_bounds = array<i64: 1, 8>}, {transform_indices = @transform_7, window_bounds = array<i64: 8, 8>}]} {
    %c0 = arith.constant 0 : index
    %c0_0 = arith.constant 0 : index
    %0 = vector.load %arg1[%c0, %c0_0] : memref<8x16xf32, #tpu.memory_space<vmem>>, vector<8x16xf32>
    %1 = arith.truncf %0 : vector<8x16xf32> to vector<8x16xbf16>
    %c0_1 = arith.constant 0 : index
    %c0_2 = arith.constant 0 : index
    %2 = vector.load %arg2[%c0_1, %c0_2] : memref<16x128xbf16, #tpu.memory_space<vmem>>, vector<16x128xbf16>
    %cst = arith.constant dense<0.000000e+00> : vector<8x128xf32>
    %3 = tpu.matmul %1, %2, %cst {dimension_numbers = #tpu.dot_dimension_numbers<[1], [0], [0], [1], [0, 0, 1, 1], [], []>} : vector<8x16xbf16>, vector<16x128xbf16>, vector<8x128xf32> -> vector<8x128xf32>
    %c0_3 = arith.constant 0 : index
    %c0_4 = arith.constant 0 : index
    %4 = vector.load %arg3[%c0_3, %c0_4] : memref<1x128xf32, #tpu.memory_space<vmem>>, vector<1x128xf32>
    %5 = vector.broadcast %4 : vector<1x128xf32> to vector<8x128xf32>
    %6 = arith.addf %3, %5 : vector<8x128xf32>
    %cst_5 = arith.constant 0.000000e+00 : f32
    %7 = vector.broadcast %cst_5 : f32 to vector<8x128xf32>
    %8 = arith.maximumf %6, %7 : vector<8x128xf32>
    %9 = arith.truncf %8 : vector<8x128xf32> to vector<8x128xbf16>
    %c0_6 = arith.constant 0 : index
    %c0_7 = arith.constant 0 : index
    %10 = vector.load %arg4[%c0_6, %c0_7] : memref<128x128xbf16, #tpu.memory_space<vmem>>, vector<128x128xbf16>
    %cst_8 = arith.constant dense<0.000000e+00> : vector<8x128xf32>
    %11 = tpu.matmul %9, %10, %cst_8 {dimension_numbers = #tpu.dot_dimension_numbers<[1], [0], [0], [1], [0, 0, 1, 1], [], []>} : vector<8x128xbf16>, vector<128x128xbf16>, vector<8x128xf32> -> vector<8x128xf32>
    %c0_9 = arith.constant 0 : index
    %c0_10 = arith.constant 0 : index
    %12 = vector.load %arg5[%c0_9, %c0_10] : memref<1x128xf32, #tpu.memory_space<vmem>>, vector<1x128xf32>
    %13 = vector.broadcast %12 : vector<1x128xf32> to vector<8x128xf32>
    %14 = arith.addf %11, %13 : vector<8x128xf32>
    %cst_11 = arith.constant 0.000000e+00 : f32
    %15 = vector.broadcast %cst_11 : f32 to vector<8x128xf32>
    %16 = arith.maximumf %14, %15 : vector<8x128xf32>
    %17 = arith.truncf %16 : vector<8x128xf32> to vector<8x128xbf16>
    %c0_12 = arith.constant 0 : index
    %c0_13 = arith.constant 0 : index
    %18 = vector.load %arg6[%c0_12, %c0_13] : memref<128x8xbf16, #tpu.memory_space<vmem>>, vector<128x8xbf16>
    %cst_14 = arith.constant dense<0.000000e+00> : vector<8x8xf32>
    %19 = tpu.matmul %17, %18, %cst_14 {dimension_numbers = #tpu.dot_dimension_numbers<[1], [0], [0], [1], [0, 0, 1, 1], [], []>} : vector<8x128xbf16>, vector<128x8xbf16>, vector<8x8xf32> -> vector<8x8xf32>
    %c0_15 = arith.constant 0 : index
    %c0_16 = arith.constant 0 : index
    %20 = vector.load %arg7[%c0_15, %c0_16] : memref<1x8xf32, #tpu.memory_space<vmem>>, vector<1x8xf32>
    %21 = vector.broadcast %20 : vector<1x8xf32> to vector<8x8xf32>
    %22 = arith.addf %19, %21 : vector<8x8xf32>
    %c0_17 = arith.constant 0 : index
    %c0_18 = arith.constant 0 : index
    %23 = vector.load %arg8[%c0_17, %c0_18] : memref<8x8xf32, #tpu.memory_space<vmem>>, vector<8x8xf32>
    tpu.vector_store %arg8[%c0_17, %c0_18], %22 {strides = array<i32>} : memref<8x8xf32, #tpu.memory_space<vmem>>, vector<8x8xf32>,
    return
  }
  func.func @transform_0(%arg0: i32) -> (i32, i32) {
    %c0_i32 = arith.constant 0 : i32
    %c0_i32_0 = arith.constant 0 : i32
    return %arg0, %c0_i32 : i32, i32
  }
  func.func @transform_1(%arg0: i32) -> (i32, i32) {
    %c0_i32 = arith.constant 0 : i32
    %c0_i32_0 = arith.constant 0 : i32
    %c0_i32_1 = arith.constant 0 : i32
    return %c0_i32, %c0_i32_0 : i32, i32
  }
  func.func @transform_2(%arg0: i32) -> (i32, i32) {
    %c0_i32 = arith.constant 0 : i32
    %c0_i32_0 = arith.constant 0 : i32
    %c0_i32_1 = arith.constant 0 : i32
    return %c0_i32, %c0_i32_0 : i32, i32
  }
  func.func @transform_3(%arg0: i32) -> (i32, i32) {
    %c0_i32 = arith.constant 0 : i32
    %c0_i32_0 = arith.constant 0 : i32
    %c0_i32_1 = arith.constant 0 : i32
    return %c0_i32, %c0_i32_0 : i32, i32
  }
  func.func @transform_4(%arg0: i32) -> (i32, i32) {
    %c0_i32 = arith.constant 0 : i32
    %c0_i32_0 = arith.constant 0 : i32
    %c0_i32_1 = arith.constant 0 : i32
    return %c0_i32, %c0_i32_0 : i32, i32
  }
  func.func @transform_5(%arg0: i32) -> (i32, i32) {
    %c0_i32 = arith.constant 0 : i32
    %c0_i32_0 = arith.constant 0 : i32
    %c0_i32_1 = arith.constant 0 : i32
    return %c0_i32, %c0_i32_0 : i32, i32
  }
  func.func @transform_6(%arg0: i32) -> (i32, i32) {
    %c0_i32 = arith.constant 0 : i32
    %c0_i32_0 = arith.constant 0 : i32
    %c0_i32_1 = arith.constant 0 : i32
    return %c0_i32, %c0_i32_0 : i32, i32
  }
  func.func @transform_7(%arg0: i32) -> (i32, i32) {
    %c0_i32 = arith.constant 0 : i32
    %c0_i32_0 = arith.constant 0 : i32
    return %arg0, %c0_i32 : i32, i32
  }
}

</mosaic_0001>

<bundles_post_ra>
// kernel: qnetwork_forward.1
= control target key start
LH: loop header
LB: loop body
LE: loop exit
PB: predicated region body
PF: predicated region fallthrough
CT: control target
= control target key end

     0   :  { %v426_v0 = vmov 0.0   ;;  %vm427_vm0 = vmmov 0   ;;  %vm44_vm1 = vcmask 130048   ;;  %vm314_vm2 = vcmask 64512   ;;  %s554_s1 = inlined_call_operand.vmem [shape: bf16[16,128], index: 1, kind: input, shape index: {}]   ;;  %s555_s0 = inlined_call_operand.vmem [shape: f32[8,16], index: 0, kind: input, shape index: {}]   ;;  %s556_s3 = inlined_call_operand.vmem [shape: bf16[128,128], index: 3, kind: input, shape index: {}]   ;;  %s557_s5 = inlined_call_operand.vmem [shape: bf16[128,8], index: 5, kind: input, shape index: {}]   ;;  %s558_s2 = inlined_call_operand.vmem [shape: f32[1,128], index: 2, kind: input, shape index: {}]   ;;  %s559_s4 = inlined_call_operand.vmem [shape: f32[1,128], index: 4, kind: input, shape index: {}]   ;;  %s560_s6 = inlined_call_operand.vmem [shape: f32[1,8], index: 6, kind: input, shape index: {}]   ;;  %s561_s7 = inlined_call_operand.vmem [shape: f32[8,8], index: 7, kind: output, shape index: {}]  }
   0x1   :  { %361 = vmatprep.subr.bf16.mxu0 %v426_v0  ;;  %v409_v1 = vld [vmem:[%s554_s1] sm:$0xff]   ;;  %363 = vmatprep.mubr.msk.bf16.mxu0 %vm427_vm0, %v426_v0  ;;  %v411_v5 = vld [vmem:[%s556_s3 + $0x8] sm:$0xff]   ;;  %v412_v6 = vld [vmem:[%s556_s3 + $0x10] sm:$0xff]  }
   0x2   :  { %v27_v2 = vld [vmem:[%s555_s0] sm:$0xff]  ;;  %367 = vmatprep.subr.bf16.mxu1 %v426_v0  ;;  %383 = vmatprep.mubr.msk.bf16.mxu1 %vm427_vm0, %v426_v0  ;;  %v413_v7 = vld [vmem:[%s556_s3 + $0x18] sm:$0xff]   ;;  %v415_v9 = vld [vmem:[%s556_s3 + $0x28] sm:$0xff]  }
   0x3   :  { %362 = vmatpush3.bf16.msra.mxu0 %v409_v1  ;;  %v28_v3 = vpack.c.bf16 %v27_v2, %v27_v2  ;;  %v410_v4 = vld [vmem:[%s556_s3] sm:$0xff]   ;;  %v416_v10 = vld [vmem:[%s556_s3 + $0x30] sm:$0xff]   ;;  %v417_v11 = vld [vmem:[%s556_s3 + $0x38] sm:$0xff]  }
   0x4   :  { %387 = vmatprep.subr.bf16.mxu0 %v426_v0  ;;  %368 = vmatpush3.bf16.msra.mxu1 %v410_v4  ;;  %v414_v8 = vld [vmem:[%s556_s3 + $0x20] sm:$0xff]   ;;  %v419_v13 = vld [vmem:[%s557_s5 + $0x8] sm:$0xff]   ;;  %v420_v14 = vld [vmem:[%s557_s5 + $0x10] sm:$0xff]  }
   0x5   :  { %369 = vmatprep.subr.bf16.mxu1 %v426_v0  ;;  %v418_v12 = vld [vmem:[%s557_s5] sm:$0xff]   ;;  %v421_v15 = vld [vmem:[%s557_s5 + $0x18] sm:$0xff]   ;;  %v423_v17 = vld [vmem:[%s557_s5 + $0x28] sm:$0xff]  }
   0x6   :  { %364 = vmatmul.mubr.msk.bf16.vlgmr.msra.gmra.mrb[0].mxu0 %vm44_vm1, %v28_v3  ;;  %v422_v16 = vld [vmem:[%s557_s5 + $0x20] sm:$0xff]   ;;  %v424_v26 = vld [vmem:[%s557_s5 + $0x30] sm:$0xff]   ;;  %v425_v27 = vld [vmem:[%s557_s5 + $0x38] sm:$0xff]  }
   0x7   :  { %403 = vmatprep.mubr.msk.bf16.mxu0 %vm427_vm0, %v426_v0  ;;  %388 = vmatpush3.bf16.msra.mxu0 %v418_v12  ;;  %v320_v18 = vld [vmem:[%s558_s2] ss:$0 sm:$0xff] }
   0x8   :  { %370 = vmatpush3.bf16.msra.mxu1 %v411_v5  ;;  %389 = vmatprep.subr.bf16.mxu0 %v426_v0  ;;  %v323_v28 = vld [vmem:[%s559_s4] ss:$0 sm:$0xff] }
   0x9   :  { %371 = vmatprep.subr.bf16.mxu1 %v426_v0  ;;  %v332_v36 = vld [vmem:[%s560_s6] ss:$0 sm:$0xff] }
   0xb   :  { %390 = vmatpush3.bf16.msra.mxu0 %v419_v13 }
   0xc   :  { %372 = vmatpush3.bf16.msra.mxu1 %v412_v6  ;;  %391 = vmatprep.subr.bf16.mxu0 %v426_v0 }
   0xd   :  { %373 = vmatprep.subr.bf16.mxu1 %v426_v0 }
   0xf   :  { %392 = vmatpush3.bf16.msra.mxu0 %v420_v14 }
  0x10   :  { %374 = vmatpush3.bf16.msra.mxu1 %v413_v7  ;;  %393 = vmatprep.subr.bf16.mxu0 %v426_v0 }
  0x11   :  { %375 = vmatprep.subr.bf16.mxu1 %v426_v0 }
  0x13   :  { %394 = vmatpush3.bf16.msra.mxu0 %v421_v15 }
  0x14   :  { %376 = vmatpush3.bf16.msra.mxu1 %v414_v8  ;;  %395 = vmatprep.subr.bf16.mxu0 %v426_v0 }
  0x15   :  { %377 = vmatprep.subr.bf16.mxu1 %v426_v0 }
  0x17   :  { %396 = vmatpush3.bf16.msra.mxu0 %v422_v16 }
  0x18   :  { %378 = vmatpush3.bf16.msra.mxu1 %v415_v9  ;;  %397 = vmatprep.subr.bf16.mxu0 %v426_v0 }
  0x19   :  { %379 = vmatprep.subr.bf16.mxu1 %v426_v0 }
  0x1b   :  { %398 = vmatpush3.bf16.msra.mxu0 %v423_v17 }
  0x1c   :  { %380 = vmatpush3.bf16.msra.mxu1 %v416_v10  ;;  %399 = vmatprep.subr.bf16.mxu0 %v426_v0 }
  0x1d   :  { %381 = vmatprep.subr.bf16.mxu1 %v426_v0 }
  0x1f   :  { %400 = vmatpush3.bf16.msra.mxu0 %v424_v26 }
  0x20   :  { %382 = vmatpush3.bf16.msra.mxu1 %v417_v11  ;;  %401 = vmatprep.subr.bf16.mxu0 %v426_v0 }
  0x23   :  { %402 = vmatpush3.bf16.msra.mxu0 %v425_v27 }
  0xd9   :  { %v82_v19 = vpop.f32.mrb[0].mxu0 }
  0xda   :  { %v83_v20 = vadd.f32 %v320_v18, %v82_v19  ;;  %v365_v21 = vpop.f32.mrb[1].mxu0 }
  0xdb   :  { %v85_v22 = vpop.f32.mrb[2].mxu0 }
  0xdc   :  { %v88_v23 = vmax.f32 %v83_v20, 0.0  ;;  %v366_v24 = vpop.f32.mrb[3].mxu0 }
  0xde   :  { %v89_v25 = vpack.c.bf16 %v88_v23, %v88_v23 }
  0xe0   :  { %384 = vmatmul.mubr.bf16.vlgmr.msra.gmra.mrb[0].mxu1 %v89_v25 }
 0x1b3   :  { %v195_v29 = vpop.f32.mrb[0].mxu1 }
 0x1b4   :  { %v196_v30 = vadd.f32 %v323_v28, %v195_v29  ;;  %v385_v31 = vpop.f32.mrb[1].mxu1 }
 0x1b5   :  { %v198_v32 = vpop.f32.mrb[2].mxu1 }
 0x1b6   :  { %v201_v33 = vmax.f32 %v196_v30, 0.0  ;;  %v386_v34 = vpop.f32.mrb[3].mxu1 }
 0x1b8   :  { %v202_v35 = vpack.c.bf16 %v201_v33, %v201_v33 }
 0x1ba   :  { %404 = vmatmul.mubr.bf16.vlgmr.msra.gmra.mrb[4].mxu0 %v202_v35 }
 0x28d   :  { %v308_v37 = vpop.f32.mrb[4].mxu0 }
 0x28e   :  { %v309_v38 = vadd.f32 %v332_v36, %v308_v37  ;;  %v405_v39 = vpop.f32.mrb[5].mxu0 }
 0x28f   :  { %v311_v40 = vpop.f32.mrb[6].mxu0 }
 0x290   :  { %315 = vst.msk [vmem:[%s561_s7] sm:$0xff] %vm314_vm2, %v309_v38  ;;  %v406_v41 = vpop.f32.mrb[7].mxu0 }

</bundles_post_ra>
